<compile_context>
chip_gen: v7x
topology: tpu7x:2x2x1
jax: 0.10.0
libtpu: 0.0.40
codegen_flags: <defaults>
</compile_context>

<pallas_src>
import numpy as np
import jax
import jax.numpy as jnp
from jax import lax
from jax.experimental import pallas as pl
from jax.experimental.pallas import tpu as pltpu

_EPS = 1e-5


# ---------------------------------------------------------------------------
# Chip-derived VMEM budgets
# ---------------------------------------------------------------------------
def _vmem_budgets():
    """(scoped vmem limit bytes, per-grid-step live-byte budget) for the current chip."""
    cap = 64 * 1024 * 1024                      # conservative default (v7x per-TC)
    try:
        info = pltpu.get_tpu_info()
        cap = int(getattr(info, "vmem_capacity_bytes", cap))
    except Exception:
        pass
    vmem_limit = min((cap * 3) // 4, 96 * 1024 * 1024)   # <=48 MiB v7x, <=96 MiB v5e/v6e
    tile_budget = min(cap // 6, 12 * 1024 * 1024)
    return vmem_limit, tile_budget


# ---------------------------------------------------------------------------
# In-kernel helpers
# ---------------------------------------------------------------------------
def _conv3(x_bf16, w_ref):
    """k=3 / stride=1 / pad=1 conv along axis 1 (the length axis).

    x_bf16 : (TB, L, Cin) bf16 activation tile.  Full L is visible per tile, so the
             halo is two zero boundary rows built in-kernel (no XLA-side padding).
    w_ref  : (3, Cin, C) bf16 per-tap weights  -> three accumulating MXU dots
             (general, non-lane-aligned Cin), or
             (3*Cin, C) bf16 fused weights     -> single MXU dot (Cin % 128 == 0).
    Returns (TB, L, C) f32 (MXU accumulates in f32).
    """
    tb, l, cin = x_bf16.shape
    zrow = jnp.zeros((tb, 1, cin), x_bf16.dtype)
    x_m1 = jnp.concatenate([zrow, x_bf16[:, : l - 1, :]], axis=1)   # x[l-1]
    x_p1 = jnp.concatenate([x_bf16[:, 1:, :], zrow], axis=1)        # x[l+1]
    if w_ref.ndim == 3:
        c = w_ref.shape[-1]
        y = (jnp.dot(x_m1.reshape(tb * l, cin), w_ref[0],
                     preferred_element_type=jnp.float32)
             + jnp.dot(x_bf16.reshape(tb * l, cin), w_ref[1],
                       preferred_element_type=jnp.float32)
             + jnp.dot(x_p1.reshape(tb * l, cin), w_ref[2],
                       preferred_element_type=jnp.float32))
    else:
        c = w_ref.shape[-1]
        im = jnp.concatenate([x_m1, x_bf16, x_p1], axis=-1)         # lane-aligned only
        y = jnp.dot(im.reshape(tb * l, 3 * cin), w_ref[...],
                    preferred_element_type=jnp.float32)
    return y.reshape(tb, l, c)


def _write_partial_stats(y_f32, s_ref):
    """One-pass per-tile BN partials (from the f32 MXU output): row 0 = sum, row 1 = sum^2."""
    c = y_f32.shape[-1]
    yf = y_f32.reshape(-1, c)
    s = jnp.sum(yf, axis=0, keepdims=True)
    sq = jnp.sum(yf * yf, axis=0, keepdims=True)
    s_ref[...] = jnp.concatenate([s, sq], axis=0)[None]             # (1, 2, C)


# ---------------------------------------------------------------------------
# Kernels
# ---------------------------------------------------------------------------
def _conv1_kernel(x_ref, w1_ref, y1_ref, s1_ref):
    """Pass A (identity shortcut): y1 = conv1(x), plus per-tile BN partials."""
    y1 = _conv3(x_ref[...], w1_ref)
    y1_ref[...] = y1.astype(y1_ref.dtype)
    _write_partial_stats(y1, s1_ref)


def _conv1_proj_kernel(x_ref, w1_ref, wsc_ref, y1_ref, s1_ref, ysc_ref, ssc_ref):
    """Pass A (projection shortcut): y1 = conv1(x), ysc = conv_sc(x), both with partials."""
    x = x_ref[...]                                                   # bf16
    y1 = _conv3(x, w1_ref)
    y1_ref[...] = y1.astype(y1_ref.dtype)
    _write_partial_stats(y1, s1_ref)

    tb, l, cin = x.shape
    ysc = jnp.dot(x.reshape(tb * l, cin), wsc_ref[...],
                  preferred_element_type=jnp.float32).reshape(tb, l, -1)
    ysc_ref[...] = ysc.astype(ysc_ref.dtype)
    _write_partial_stats(ysc, ssc_ref)


def _bn_relu_conv2_kernel(y1_ref, sc1_ref, sh1_ref, mask_ref, w2_ref, y2_ref, s2_ref):
    """Pass B: h = relu(bn1(y1)) (folded scale/shift), y2 = conv2(h) + partials.

    mask zeroes padded batch rows so they cannot pollute the BN2 partial sums."""
    h = jnp.maximum(y1_ref[...].astype(jnp.float32) * sc1_ref[...] + sh1_ref[...], 0.0)
    h = h * mask_ref[...]
    y2 = _conv3(h.astype(jnp.bfloat16), w2_ref)
    y2_ref[...] = y2.astype(y2_ref.dtype)
    _write_partial_stats(y2, s2_ref)


def _finalize_proj_kernel(y2_ref, sc2_ref, sh2_ref, ysc_ref, scs_ref, shs_ref, o_ref):
    """Pass C (projection): out = relu(bn2(y2) + bn_sc(ysc)), bf16 writeback."""
    main = y2_ref[...].astype(jnp.float32) * sc2_ref[...] + sh2_ref[...]
    short = ysc_ref[...].astype(jnp.float32) * scs_ref[...] + shs_ref[...]
    o_ref[...] = jnp.maximum(main + short, 0.0).astype(o_ref.dtype)


def _finalize_id_kernel(y2_ref, sc2_ref, sh2_ref, x_ref, o_ref):
    """Pass C (identity): out = relu(bn2(y2) + x), bf16 writeback."""
    main = y2_ref[...].astype(jnp.float32) * sc2_ref[...] + sh2_ref[...]
    o_ref[...] = jnp.maximum(main + x_ref[...].astype(jnp.float32), 0.0).astype(o_ref.dtype)


# ---------------------------------------------------------------------------
# Wrapper
# ---------------------------------------------------------------------------
def _pick_batch_tile(B, L, cin, c, has_proj, tile_budget):
    """Largest batch tile whose per-grid-step live bytes (2x double-buffered BlockSpec
    blocks + in-kernel temporaries) fit the budget.  Prefers >= 4 grid steps (>= 2 per
    TensorCore on a 2-TC chip), then >= 2, then 1.  Non-divisor TB is allowed (the
    wrapper pads the batch)."""
    def est(tb):
        a_blk = L * (2 * cin + 2 * c + (2 * c if has_proj else 0))          # bf16 blocks
        a_tmp = L * (2 * 2 * cin + 4 * c + (4 * c if has_proj else 0))      # shifts + f32 acc
        b_blk = L * (2 * c + 2 * c)
        b_tmp = L * (4 * c + 2 * c + 2 * 2 * c + 4 * c)                     # h f32/bf16, shifts, acc
        c_blk = L * (2 * c + (2 * c if has_proj else 2 * cin) + 2 * c)
        c_tmp = L * (2 * 4 * c)
        return tb * max(2 * a_blk + a_tmp, 2 * b_blk + b_tmp, 2 * c_blk + c_tmp)

    for min_steps in (4, 2, 1):
        cand = [tb for tb in range(1, B + 1)
                if est(tb) <= tile_budget and pl.cdiv(B, tb) >= min_steps]
        if cand:
            return max(cand)
    return 1


def _bn_scale_shift(partials, gamma, beta, count):
    """Reduce per-tile (sum, sumsq) partials into a per-channel affine (scale, shift)."""
    s = jnp.sum(partials[:, 0, :], axis=0)
    sq = jnp.sum(partials[:, 1, :], axis=0)
    mean = s / count
    var = jnp.maximum(sq / count - mean * mean, 0.0)                 # biased (training) var
    scale = gamma.astype(jnp.float32) * lax.rsqrt(var + _EPS)
    shift = beta.astype(jnp.float32) - mean * scale
    return scale.reshape(1, 1, -1), shift.reshape(1, 1, -1)


def basic_block_forward(x_ncl, params, stride=1):
    assert stride == 1, "only stride=1 implemented"                  # TODO(synk): stride > 1
    B, Cin, L = x_ncl.shape
    assert L % 8 == 0, "L must be a multiple of 8 (sublane-aligned in-kernel shifts)"
    C = params["w1"].shape[0]                                        # planes
    has_proj = (stride != 1) or (Cin != C)
    f32, bf16 = jnp.float32, jnp.bfloat16

    vmem_limit, tile_budget = _vmem_budgets()

    # NCL -> NLC (channels on lanes); bf16 MXU operands, f32 accumulation / BN math.
    x_nlc = jnp.transpose(x_ncl, (0, 2, 1)).astype(bf16)             # (B, L, Cin)

    TB = _pick_batch_tile(B, L, Cin, C, has_proj, tile_budget)
    nb = int(pl.cdiv(B, TB))
    Bp = nb * TB
    if Bp != B:                                                      # zero-padded tail tile
        x_nlc = jnp.pad(x_nlc, ((0, Bp - B), (0, 0), (0, 0)))
    valid = (jnp.arange(Bp) < B).astype(f32).reshape(Bp, 1, 1)       # pad-row mask (pass B)
    count = float(B * L)                                             # true BN count

    # Per-tap (3, Cin, C) weights in the general case; fused (3*Cin, C) only when the
    # contraction dim is lane-aligned (Cin % 128 == 0) so the im2col concat is free.
    def pack_w(w):                                                   # (Cout, Cin_, 3)
        cin_ = w.shape[1]
        wt = jnp.transpose(w, (2, 1, 0)).astype(bf16)                # (3, Cin_, Cout)
        return wt.reshape(3 * cin_, w.shape[0]) if cin_ % 128 == 0 else wt

    w1f = pack_w(params["w1"])
    w2f = pack_w(params["w2"])

    cparams = pltpu.CompilerParams(dimension_semantics=("parallel",),
                                   vmem_limit_bytes=int(vmem_limit))

    def tile_spec(cdim):
        return pl.BlockSpec((TB, L, cdim), lambda i: (i, 0, 0))

    def full_spec(shape):
        return pl.BlockSpec(shape, lambda i, _s=len(shape): (0,) * _s)

    def stat_spec():
        return pl.BlockSpec((1, 2, C), lambda i: (i, 0, 0))

    def vec_spec():
        return pl.BlockSpec((1, 1, C), lambda i: (0, 0, 0))

    def mask_spec():
        return pl.BlockSpec((TB, 1, 1), lambda i: (i, 0, 0))

    stat_shape = jax.ShapeDtypeStruct((nb, 2, C), f32)
    act_shape = jax.ShapeDtypeStruct((Bp, L, C), bf16)

    # ---- pass A: y1 = conv1(x) (+ ysc = conv_sc(x)), per-tile BN partials ----------
    flops_a = 2 * Bp * L * 3 * Cin * C + (2 * Bp * L * Cin * C if has_proj else 0)
    bytes_a = (Bp * L * Cin * 2 + 3 * Cin * C * 2 + Bp * L * C * 2 + nb * 2 * C * 4
               + (Bp * L * C * 2 + Cin * C * 2 + nb * 2 * C * 4 if has_proj else 0))
    if has_proj:
        wscf = jnp.transpose(params["wsc"][:, :, 0], (1, 0)).astype(bf16)   # (Cin, C)
        y1, s1, ysc, ssc = pl.pallas_call(
            _conv1_proj_kernel,
            grid=(nb,),
            in_specs=[tile_spec(Cin), full_spec(w1f.shape), full_spec(wscf.shape)],
            out_specs=(tile_spec(C), stat_spec(), tile_spec(C), stat_spec()),
            out_shape=(act_shape, stat_shape, act_shape, stat_shape),
            compiler_params=cparams,
            cost_estimate=pl.CostEstimate(flops=int(flops_a), transcendentals=0,
                                          bytes_accessed=int(bytes_a)),
        )(x_nlc, w1f, wscf)
    else:
        y1, s1 = pl.pallas_call(
            _conv1_kernel,
            grid=(nb,),
            in_specs=[tile_spec(Cin), full_spec(w1f.shape)],
            out_specs=(tile_spec(C), stat_spec()),
            out_shape=(act_shape, stat_shape),
            compiler_params=cparams,
            cost_estimate=pl.CostEstimate(flops=int(flops_a), transcendentals=0,
                                          bytes_accessed=int(bytes_a)),
        )(x_nlc, w1f)

    scale1, shift1 = _bn_scale_shift(s1, params["bn1_gamma"], params["bn1_beta"], count)

    # ---- pass B: h = relu(bn1(y1)) * mask; y2 = conv2(h); per-tile BN partials -----
    flops_b = 2 * Bp * L * 3 * C * C + 5 * Bp * L * C
    bytes_b = 2 * Bp * L * C * 2 + 3 * C * C * 2 + nb * 2 * C * 4 + 2 * C * 4 + Bp * 4
    y2, s2 = pl.pallas_call(
        _bn_relu_conv2_kernel,
        grid=(nb,),
        in_specs=[tile_spec(C), vec_spec(), vec_spec(), mask_spec(), full_spec(w2f.shape)],
        out_specs=(tile_spec(C), stat_spec()),
        out_shape=(act_shape, stat_shape),
        compiler_params=cparams,
        cost_estimate=pl.CostEstimate(flops=int(flops_b), transcendentals=0,
                                      bytes_accessed=int(bytes_b)),
    )(y1, scale1, shift1, valid, w2f)

    scale2, shift2 = _bn_scale_shift(s2, params["bn2_gamma"], params["bn2_beta"], count)

    # ---- pass C: out = relu(bn2(y2) + shortcut), bf16 writeback ---------------------
    out_shape = jax.ShapeDtypeStruct((Bp, L, C), bf16)
    if has_proj:
        scale_sc, shift_sc = _bn_scale_shift(ssc, params["bnsc_gamma"],
                                             params["bnsc_beta"], count)
        out_nlc = pl.pallas_call(
            _finalize_proj_kernel,
            grid=(nb,),
            in_specs=[tile_spec(C), vec_spec(), vec_spec(),
                      tile_spec(C), vec_spec(), vec_spec()],
            out_specs=tile_spec(C),
            out_shape=out_shape,
            compiler_params=cparams,
        )(y2, scale2, shift2, ysc, scale_sc, shift_sc)
    else:
        out_nlc = pl.pallas_call(
            _finalize_id_kernel,
            grid=(nb,),
            in_specs=[tile_spec(C), vec_spec(), vec_spec(), tile_spec(C)],
            out_specs=tile_spec(C),
            out_shape=out_shape,
            compiler_params=cparams,
        )(y2, scale2, shift2, x_nlc)

    # NLC -> NCL on the bf16 array (half the bytes of the previous f32 transpose pass).
    # TODO(synk): fuse this transpose into pass C (in-kernel minor-dim transpose /
    # pltpu.einshape) once the C/L tile sizes are (8,128)-aligned.
    return jnp.transpose(out_nlc[:B], (0, 2, 1))                     # (B, C, L) bf16


# ---------------------------------------------------------------------------
# Pure-JAX reference (independent of the kernels), PyTorch NCL convention
# ---------------------------------------------------------------------------
def basic_block_reference(x_ncl, params, stride=1):
    def conv1d(x, w, s, p):
        return lax.conv_general_dilated(
            x, w, window_strides=(s,), padding=[(p, p)],
            dimension_numbers=("NCH", "OIH", "NCH"))

    def bn(y, g, b):
        mean = jnp.mean(y, axis=(0, 2), keepdims=True)
        var = jnp.mean(jnp.square(y - mean), axis=(0, 2), keepdims=True)
        return ((y - mean) * lax.rsqrt(var + _EPS) * g.reshape(1, -1, 1)
                + b.reshape(1, -1, 1))

    Cin = x_ncl.shape[1]
    C = params["w1"].shape[0]
    h = jax.nn.relu(bn(conv1d(x_ncl, params["w1"], stride, 1),
                       params["bn1_gamma"], params["bn1_beta"]))
    o = bn(conv1d(h, params["w2"], 1, 1),
           params["bn2_gamma"], params["bn2_beta"])
    if stride != 1 or Cin != C:
        sc = bn(conv1d(x_ncl, params["wsc"], stride, 0),
                params["bnsc_gamma"], params["bnsc_beta"])
    else:
        sc = x_ncl
    return jax.nn.relu(o + sc)


# ---------------------------------------------------------------------------
if __name__ == "__main__":
    key = jax.random.PRNGKey(0)
    B, Cin, L, C = 2, 4, 16, 8          # in_planes=4 != planes=8 -> projection shortcut
    k0, k1, k2, k3, k4 = jax.random.split(key, 5)

    x = jax.random.normal(k0, (B, Cin, L), jnp.float32)              # PyTorch NCL input
    params = {
        "w1": 0.1 * jax.random.normal(k1, (C, Cin, 3), jnp.float32),
        "w2": 0.1 * jax.random.normal(k2, (C, C, 3), jnp.float32),
        "wsc": 0.1 * jax.random.normal(k3, (C, Cin, 1), jnp.float32),
        "bn1_gamma": jnp.ones((C,), jnp.float32),
        "bn1_beta": jnp.zeros((C,), jnp.float32),
        "bn2_gamma": jnp.ones((C,), jnp.float32),
        "bn2_beta": jnp.zeros((C,), jnp.float32),
        "bnsc_gamma": jnp.ones((C,), jnp.float32),
        "bnsc_beta": jnp.zeros((C,), jnp.float32),
    }

    fwd = jax.jit(lambda xx, pp: basic_block_forward(xx, pp, stride=1))

    out = fwd(x, params)
    jax.block_until_ready(out)
    ref = basic_block_reference(x, params, stride=1)
    # bf16 MXU operands + bf16 HBM intermediates/output -> loosened tolerance vs f32 ref.
    np.testing.assert_allclose(np.asarray(out.astype(jnp.float32)), np.asarray(ref),
                               rtol=5e-2, atol=5e-2)

    # Also exercise the identity-shortcut path (in_planes == planes, stride=1).
    x_id = jax.random.normal(k4, (B, C, L), jnp.float32)
    params_id = {
        "w1": params["w2"], "w2": params["w2"],
        "bn1_gamma": params["bn1_gamma"], "bn1_beta": params["bn1_beta"],
        "bn2_gamma": params["bn2_gamma"], "bn2_beta": params["bn2_beta"],
    }
    out_id = fwd(x_id, params_id)
    jax.block_until_ready(out_id)
    ref_id = basic_block_reference(x_id, params_id, stride=1)
    np.testing.assert_allclose(np.asarray(out_id.astype(jnp.float32)), np.asarray(ref_id),
                               rtol=5e-2, atol=5e-2)

    print("KERNEL_OK")
</pallas_src>

<mosaic_0001>
module attributes {stable_mosaic.version = 11 : i64} {
  func.func @_bn_relu_conv2_kernel(%arg0: i32, %arg1: memref<1x16x8xbf16, #tpu.memory_space<vmem>>, %arg2: memref<1x1x8xf32, #tpu.memory_space<vmem>>, %arg3: memref<1x1x8xf32, #tpu.memory_space<vmem>>, %arg4: memref<1x1x1xf32, #tpu.memory_space<vmem>>, %arg5: memref<3x8x8xbf16, #tpu.memory_space<vmem>>, %arg6: memref<1x16x8xbf16, #tpu.memory_space<vmem>>, %arg7: memref<1x2x8xf32, #tpu.memory_space<vmem>>) attributes {dimension_semantics = [#tpu.dimension_semantics<parallel>], iteration_bounds = array<i64: 2>, scalar_prefetch = 0 : i64, scratch_operands = 0 : i64, tpu.core_type = #tpu.core_type<tc>, window_params = [{transform_indices = @transform_0, window_bounds = array<i64: 1, 16, 8>}, {pipeline_mode = #tpu.pipeline_mode<synchronous>, transform_indices = @transform_1, window_bounds = array<i64: 1, 1, 8>}, {pipeline_mode = #tpu.pipeline_mode<synchronous>, transform_indices = @transform_2, window_bounds = array<i64: 1, 1, 8>}, {transform_indices = @transform_3, window_bounds = array<i64: 1, 1, 1>}, {pipeline_mode = #tpu.pipeline_mode<synchronous>, transform_indices = @transform_4, window_bounds = array<i64: 3, 8, 8>}, {transform_indices = @transform_5, window_bounds = array<i64: 1, 16, 8>}, {transform_indices = @transform_6, window_bounds = array<i64: 1, 2, 8>}]} {
    %c0 = arith.constant 0 : index
    %c0_0 = arith.constant 0 : index
    %c0_1 = arith.constant 0 : index
    %0 = vector.load %arg1[%c0, %c0_0, %c0_1] : memref<1x16x8xbf16, #tpu.memory_space<vmem>>, vector<1x16x8xbf16>
    %1 = arith.extf %0 : vector<1x16x8xbf16> to vector<1x16x8xf32>
    %c0_2 = arith.constant 0 : index
    %c0_3 = arith.constant 0 : index
    %c0_4 = arith.constant 0 : index
    %2 = vector.load %arg2[%c0_2, %c0_3, %c0_4] : memref<1x1x8xf32, #tpu.memory_space<vmem>>, vector<1x1x8xf32>
    %3 = vector.broadcast %2 : vector<1x1x8xf32> to vector<1x16x8xf32>
    %4 = arith.mulf %1, %3 : vector<1x16x8xf32>
    %c0_5 = arith.constant 0 : index
    %c0_6 = arith.constant 0 : index
    %c0_7 = arith.constant 0 : index
    %5 = vector.load %arg3[%c0_5, %c0_6, %c0_7] : memref<1x1x8xf32, #tpu.memory_space<vmem>>, vector<1x1x8xf32>
    %6 = vector.broadcast %5 : vector<1x1x8xf32> to vector<1x16x8xf32>
    %7 = arith.addf %4, %6 : vector<1x16x8xf32>
    %cst = arith.constant 0.000000e+00 : f32
    %8 = vector.broadcast %cst : f32 to vector<1x16x8xf32>
    %9 = arith.maximumf %7, %8 : vector<1x16x8xf32>
    %c0_8 = arith.constant 0 : index
    %c0_9 = arith.constant 0 : index
    %c0_10 = arith.constant 0 : index
    %10 = vector.load %arg4[%c0_8, %c0_9, %c0_10] : memref<1x1x1xf32, #tpu.memory_space<vmem>>, vector<1x1x1xf32>
    %11 = vector.broadcast %10 : vector<1x1x1xf32> to vector<1x16x8xf32>
    %12 = arith.mulf %9, %11 : vector<1x16x8xf32>
    %13 = arith.truncf %12 : vector<1x16x8xf32> to vector<1x16x8xbf16>
    %cst_11 = arith.constant 0.000000e+00 : bf16
    %14 = vector.broadcast %cst_11 : bf16 to vector<1x1x8xbf16>
    %15 = vector.extract_strided_slice %13 {offsets = [0, 0, 0], sizes = [1, 15, 8], strides = [1, 1, 1]} : vector<1x16x8xbf16> to vector<1x15x8xbf16>
    %16 = tpu.concatenate %14, %15 in 1 : vector<1x1x8xbf16>, vector<1x15x8xbf16> -> vector<1x16x8xbf16>
    %17 = vector.extract_strided_slice %13 {offsets = [0, 1, 0], sizes = [1, 15, 8], strides = [1, 1, 1]} : vector<1x16x8xbf16> to vector<1x15x8xbf16>
    %18 = tpu.concatenate %17, %14 in 1 : vector<1x15x8xbf16>, vector<1x1x8xbf16> -> vector<1x16x8xbf16>
    %19 = vector.shape_cast %16 : vector<1x16x8xbf16> to vector<16x8xbf16>
    %c0_12 = arith.constant 0 : index
    %c0_13 = arith.constant 0 : index
    %c0_14 = arith.constant 0 : index
    %20 = vector.load %arg5[%c0_12, %c0_13, %c0_14] : memref<3x8x8xbf16, #tpu.memory_space<vmem>>, vector<1x8x8xbf16>
    %21 = vector.shape_cast %20 : vector<1x8x8xbf16> to vector<8x8xbf16>
    %cst_15 = arith.constant dense<0.000000e+00> : vector<16x8xf32>
    %22 = tpu.matmul %19, %21, %cst_15 {dimension_numbers = #tpu.dot_dimension_numbers<[1], [0], [0], [1], [0, 0, 1, 1], [], []>} : vector<16x8xbf16>, vector<8x8xbf16>, vector<16x8xf32> -> vector<16x8xf32>
    %23 = vector.shape_cast %13 : vector<1x16x8xbf16> to vector<16x8xbf16>
    %c1 = arith.constant 1 : index
    %c0_16 = arith.constant 0 : index
    %c0_17 = arith.constant 0 : index
    %24 = vector.load %arg5[%c1, %c0_16, %c0_17] : memref<3x8x8xbf16, #tpu.memory_space<vmem>>, vector<1x8x8xbf16>
    %25 = vector.shape_cast %24 : vector<1x8x8xbf16> to vector<8x8xbf16>
    %cst_18 = arith.constant dense<0.000000e+00> : vector<16x8xf32>
    %26 = tpu.matmul %23, %25, %cst_18 {dimension_numbers = #tpu.dot_dimension_numbers<[1], [0], [0], [1], [0, 0, 1, 1], [], []>} : vector<16x8xbf16>, vector<8x8xbf16>, vector<16x8xf32> -> vector<16x8xf32>
    %27 = arith.addf %22, %26 : vector<16x8xf32>
    %28 = vector.shape_cast %18 : vector<1x16x8xbf16> to vector<16x8xbf16>
    %c2 = arith.constant 2 : index
    %c0_19 = arith.constant 0 : index
    %c0_20 = arith.constant 0 : index
    %29 = vector.load %arg5[%c2, %c0_19, %c0_20] : memref<3x8x8xbf16, #tpu.memory_space<vmem>>, vector<1x8x8xbf16>
    %30 = vector.shape_cast %29 : vector<1x8x8xbf16> to vector<8x8xbf16>
    %cst_21 = arith.constant dense<0.000000e+00> : vector<16x8xf32>
    %31 = tpu.matmul %28, %30, %cst_21 {dimension_numbers = #tpu.dot_dimension_numbers<[1], [0], [0], [1], [0, 0, 1, 1], [], []>} : vector<16x8xbf16>, vector<8x8xbf16>, vector<16x8xf32> -> vector<16x8xf32>
    %32 = arith.addf %27, %31 : vector<16x8xf32>
    %33 = vector.shape_cast %32 : vector<16x8xf32> to vector<1x16x8xf32>
    %34 = arith.truncf %33 : vector<1x16x8xf32> to vector<1x16x8xbf16>
    %c0_22 = arith.constant 0 : index
    %c0_23 = arith.constant 0 : index
    %c0_24 = arith.constant 0 : index
    %35 = vector.load %arg6[%c0_22, %c0_23, %c0_24] : memref<1x16x8xbf16, #tpu.memory_space<vmem>>, vector<1x16x8xbf16>
    tpu.vector_store %arg6[%c0_22, %c0_23, %c0_24], %34 {strides = array<i32>} : memref<1x16x8xbf16, #tpu.memory_space<vmem>>, vector<1x16x8xbf16>,
    %36 = vector.shape_cast %33 : vector<1x16x8xf32> to vector<16x8xf32>
    %cst_25 = arith.constant dense<0.000000e+00> : vector<8xf32>
    %37 = vector.multi_reduction <add>, %36, %cst_25 [0] : vector<16x8xf32> to vector<8xf32>
    %38 = vector.shape_cast %37 : vector<8xf32> to vector<1x8xf32>
    %39 = arith.mulf %36, %36 : vector<16x8xf32>
    %cst_26 = arith.constant dense<0.000000e+00> : vector<8xf32>
    %40 = vector.multi_reduction <add>, %39, %cst_26 [0] : vector<16x8xf32> to vector<8xf32>
    %41 = vector.shape_cast %40 : vector<8xf32> to vector<1x8xf32>
    %42 = tpu.concatenate %38, %41 in 0 : vector<1x8xf32>, vector<1x8xf32> -> vector<2x8xf32>
    %43 = vector.shape_cast %42 : vector<2x8xf32> to vector<1x2x8xf32>
    %c0_27 = arith.constant 0 : index
    %c0_28 = arith.constant 0 : index
    %c0_29 = arith.constant 0 : index
    %44 = vector.load %arg7[%c0_27, %c0_28, %c0_29] : memref<1x2x8xf32, #tpu.memory_space<vmem>>, vector<1x2x8xf32>
    tpu.vector_store %arg7[%c0_27, %c0_28, %c0_29], %43 {strides = array<i32>} : memref<1x2x8xf32, #tpu.memory_space<vmem>>, vector<1x2x8xf32>,
    return
  }
  func.func @transform_0(%arg0: i32) -> (i32, i32, i32) {
    %c0_i32 = arith.constant 0 : i32
    %c0_i32_0 = arith.constant 0 : i32
    %c0_i32_1 = arith.constant 0 : i32
    return %arg0, %c0_i32, %c0_i32_0 : i32, i32, i32
  }
  func.func @transform_1(%arg0: i32) -> (i32, i32, i32) {
    %c0_i32 = arith.constant 0 : i32
    %c0_i32_0 = arith.constant 0 : i32
    %c0_i32_1 = arith.constant 0 : i32
    %c0_i32_2 = arith.constant 0 : i32
    return %c0_i32, %c0_i32_0, %c0_i32_1 : i32, i32, i32
  }
  func.func @transform_2(%arg0: i32) -> (i32, i32, i32) {
    %c0_i32 = arith.constant 0 : i32
    %c0_i32_0 = arith.constant 0 : i32
    %c0_i32_1 = arith.constant 0 : i32
    %c0_i32_2 = arith.constant 0 : i32
    return %c0_i32, %c0_i32_0, %c0_i32_1 : i32, i32, i32
  }
  func.func @transform_3(%arg0: i32) -> (i32, i32, i32) {
    %c0_i32 = arith.constant 0 : i32
    %c0_i32_0 = arith.constant 0 : i32
    %c0_i32_1 = arith.constant 0 : i32
    return %arg0, %c0_i32, %c0_i32_0 : i32, i32, i32
  }
  func.func @transform_4(%arg0: i32) -> (i32, i32, i32) {
    %c0_i32 = arith.constant 0 : i32
    %c0_i32_0 = arith.constant 0 : i32
    %c0_i32_1 = arith.constant 0 : i32
    %c0_i32_2 = arith.constant 0 : i32
    return %c0_i32, %c0_i32_0, %c0_i32_1 : i32, i32, i32
  }
  func.func @transform_5(%arg0: i32) -> (i32, i32, i32) {
    %c0_i32 = arith.constant 0 : i32
    %c0_i32_0 = arith.constant 0 : i32
    %c0_i32_1 = arith.constant 0 : i32
    return %arg0, %c0_i32, %c0_i32_0 : i32, i32, i32
  }
  func.func @transform_6(%arg0: i32) -> (i32, i32, i32) {
    %c0_i32 = arith.constant 0 : i32
    %c0_i32_0 = arith.constant 0 : i32
    %c0_i32_1 = arith.constant 0 : i32
    return %arg0, %c0_i32, %c0_i32_0 : i32, i32, i32
  }
}

module attributes {stable_mosaic.version = 11 : i64} {
  func.func @_finalize_proj_kernel(%arg0: i32, %arg1: memref<1x16x8xbf16, #tpu.memory_space<vmem>>, %arg2: memref<1x1x8xf32, #tpu.memory_space<vmem>>, %arg3: memref<1x1x8xf32, #tpu.memory_space<vmem>>, %arg4: memref<1x16x8xbf16, #tpu.memory_space<vmem>>, %arg5: memref<1x1x8xf32, #tpu.memory_space<vmem>>, %arg6: memref<1x1x8xf32, #tpu.memory_space<vmem>>, %arg7: memref<1x16x8xbf16, #tpu.memory_space<vmem>>) attributes {dimension_semantics = [#tpu.dimension_semantics<parallel>], iteration_bounds = array<i64: 2>, scalar_prefetch = 0 : i64, scratch_operands = 0 : i64, tpu.core_type = #tpu.core_type<tc>, window_params = [{transform_indices = @transform_0, window_bounds = array<i64: 1, 16, 8>}, {pipeline_mode = #tpu.pipeline_mode<synchronous>, transform_indices = @transform_1, window_bounds = array<i64: 1, 1, 8>}, {pipeline_mode = #tpu.pipeline_mode<synchronous>, transform_indices = @transform_2, window_bounds = array<i64: 1, 1, 8>}, {transform_indices = @transform_3, window_bounds = array<i64: 1, 16, 8>}, {pipeline_mode = #tpu.pipeline_mode<synchronous>, transform_indices = @transform_4, window_bounds = array<i64: 1, 1, 8>}, {pipeline_mode = #tpu.pipeline_mode<synchronous>, transform_indices = @transform_5, window_bounds = array<i64: 1, 1, 8>}, {transform_indices = @transform_6, window_bounds = array<i64: 1, 16, 8>}]} {
    %c0 = arith.constant 0 : index
    %c0_0 = arith.constant 0 : index
    %c0_1 = arith.constant 0 : index
    %0 = vector.load %arg1[%c0, %c0_0, %c0_1] : memref<1x16x8xbf16, #tpu.memory_space<vmem>>, vector<1x16x8xbf16>
    %1 = arith.extf %0 : vector<1x16x8xbf16> to vector<1x16x8xf32>
    %c0_2 = arith.constant 0 : index
    %c0_3 = arith.constant 0 : index
    %c0_4 = arith.constant 0 : index
    %2 = vector.load %arg2[%c0_2, %c0_3, %c0_4] : memref<1x1x8xf32, #tpu.memory_space<vmem>>, vector<1x1x8xf32>
    %3 = vector.broadcast %2 : vector<1x1x8xf32> to vector<1x16x8xf32>
    %4 = arith.mulf %1, %3 : vector<1x16x8xf32>
    %c0_5 = arith.constant 0 : index
    %c0_6 = arith.constant 0 : index
    %c0_7 = arith.constant 0 : index
    %5 = vector.load %arg3[%c0_5, %c0_6, %c0_7] : memref<1x1x8xf32, #tpu.memory_space<vmem>>, vector<1x1x8xf32>
    %6 = vector.broadcast %5 : vector<1x1x8xf32> to vector<1x16x8xf32>
    %7 = arith.addf %4, %6 : vector<1x16x8xf32>
    %c0_8 = arith.constant 0 : index
    %c0_9 = arith.constant 0 : index
    %c0_10 = arith.constant 0 : index
    %8 = vector.load %arg4[%c0_8, %c0_9, %c0_10] : memref<1x16x8xbf16, #tpu.memory_space<vmem>>, vector<1x16x8xbf16>
    %9 = arith.extf %8 : vector<1x16x8xbf16> to vector<1x16x8xf32>
    %c0_11 = arith.constant 0 : index
    %c0_12 = arith.constant 0 : index
    %c0_13 = arith.constant 0 : index
    %10 = vector.load %arg5[%c0_11, %c0_12, %c0_13] : memref<1x1x8xf32, #tpu.memory_space<vmem>>, vector<1x1x8xf32>
    %11 = vector.broadcast %10 : vector<1x1x8xf32> to vector<1x16x8xf32>
    %12 = arith.mulf %9, %11 : vector<1x16x8xf32>
    %c0_14 = arith.constant 0 : index
    %c0_15 = arith.constant 0 : index
    %c0_16 = arith.constant 0 : index
    %13 = vector.load %arg6[%c0_14, %c0_15, %c0_16] : memref<1x1x8xf32, #tpu.memory_space<vmem>>, vector<1x1x8xf32>
    %14 = vector.broadcast %13 : vector<1x1x8xf32> to vector<1x16x8xf32>
    %15 = arith.addf %12, %14 : vector<1x16x8xf32>
    %16 = arith.addf %7, %15 : vector<1x16x8xf32>
    %cst = arith.constant 0.000000e+00 : f32
    %17 = vector.broadcast %cst : f32 to vector<1x16x8xf32>
    %18 = arith.maximumf %16, %17 : vector<1x16x8xf32>
    %19 = arith.truncf %18 : vector<1x16x8xf32> to vector<1x16x8xbf16>
    %c0_17 = arith.constant 0 : index
    %c0_18 = arith.constant 0 : index
    %c0_19 = arith.constant 0 : index
    %20 = vector.load %arg7[%c0_17, %c0_18, %c0_19] : memref<1x16x8xbf16, #tpu.memory_space<vmem>>, vector<1x16x8xbf16>
    tpu.vector_store %arg7[%c0_17, %c0_18, %c0_19], %19 {strides = array<i32>} : memref<1x16x8xbf16, #tpu.memory_space<vmem>>, vector<1x16x8xbf16>,
    return
  }
  func.func @transform_0(%arg0: i32) -> (i32, i32, i32) {
    %c0_i32 = arith.constant 0 : i32
    %c0_i32_0 = arith.constant 0 : i32
    %c0_i32_1 = arith.constant 0 : i32
    return %arg0, %c0_i32, %c0_i32_0 : i32, i32, i32
  }
  func.func @transform_1(%arg0: i32) -> (i32, i32, i32) {
    %c0_i32 = arith.constant 0 : i32
    %c0_i32_0 = arith.constant 0 : i32
    %c0_i32_1 = arith.constant 0 : i32
    %c0_i32_2 = arith.constant 0 : i32
    return %c0_i32, %c0_i32_0, %c0_i32_1 : i32, i32, i32
  }
  func.func @transform_2(%arg0: i32) -> (i32, i32, i32) {
    %c0_i32 = arith.constant 0 : i32
    %c0_i32_0 = arith.constant 0 : i32
    %c0_i32_1 = arith.constant 0 : i32
    %c0_i32_2 = arith.constant 0 : i32
    return %c0_i32, %c0_i32_0, %c0_i32_1 : i32, i32, i32
  }
  func.func @transform_3(%arg0: i32) -> (i32, i32, i32) {
    %c0_i32 = arith.constant 0 : i32
    %c0_i32_0 = arith.constant 0 : i32
    %c0_i32_1 = arith.constant 0 : i32
    return %arg0, %c0_i32, %c0_i32_0 : i32, i32, i32
  }
  func.func @transform_4(%arg0: i32) -> (i32, i32, i32) {
    %c0_i32 = arith.constant 0 : i32
    %c0_i32_0 = arith.constant 0 : i32
    %c0_i32_1 = arith.constant 0 : i32
    %c0_i32_2 = arith.constant 0 : i32
    return %c0_i32, %c0_i32_0, %c0_i32_1 : i32, i32, i32
  }
  func.func @transform_5(%arg0: i32) -> (i32, i32, i32) {
    %c0_i32 = arith.constant 0 : i32
    %c0_i32_0 = arith.constant 0 : i32
    %c0_i32_1 = arith.constant 0 : i32
    %c0_i32_2 = arith.constant 0 : i32
    return %c0_i32, %c0_i32_0, %c0_i32_1 : i32, i32, i32
  }
  func.func @transform_6(%arg0: i32) -> (i32, i32, i32) {
    %c0_i32 = arith.constant 0 : i32
    %c0_i32_0 = arith.constant 0 : i32
    %c0_i32_1 = arith.constant 0 : i32
    return %arg0, %c0_i32, %c0_i32_0 : i32, i32, i32
  }
}

module attributes {stable_mosaic.version = 11 : i64} {
  func.func @_conv1_proj_kernel(%arg0: i32, %arg1: memref<1x16x4xbf16, #tpu.memory_space<vmem>>, %arg2: memref<3x4x8xbf16, #tpu.memory_space<vmem>>, %arg3: memref<4x8xbf16, #tpu.memory_space<vmem>>, %arg4: memref<1x16x8xbf16, #tpu.memory_space<vmem>>, %arg5: memref<1x2x8xf32, #tpu.memory_space<vmem>>, %arg6: memref<1x16x8xbf16, #tpu.memory_space<vmem>>, %arg7: memref<1x2x8xf32, #tpu.memory_space<vmem>>) attributes {dimension_semantics = [#tpu.dimension_semantics<parallel>], iteration_bounds = array<i64: 2>, scalar_prefetch = 0 : i64, scratch_operands = 0 : i64, tpu.core_type = #tpu.core_type<tc>, window_params = [{transform_indices = @transform_0, window_bounds = array<i64: 1, 16, 4>}, {pipeline_mode = #tpu.pipeline_mode<synchronous>, transform_indices = @transform_1, window_bounds = array<i64: 3, 4, 8>}, {pipeline_mode = #tpu.pipeline_mode<synchronous>, transform_indices = @transform_2, window_bounds = array<i64: 4, 8>}, {transform_indices = @transform_3, window_bounds = array<i64: 1, 16, 8>}, {transform_indices = @transform_4, window_bounds = array<i64: 1, 2, 8>}, {transform_indices = @transform_5, window_bounds = array<i64: 1, 16, 8>}, {transform_indices = @transform_6, window_bounds = array<i64: 1, 2, 8>}]} {
    %c0 = arith.constant 0 : index
    %c0_0 = arith.constant 0 : index
    %c0_1 = arith.constant 0 : index
    %0 = vector.load %arg1[%c0, %c0_0, %c0_1] : memref<1x16x4xbf16, #tpu.memory_space<vmem>>, vector<1x16x4xbf16>
    %cst = arith.constant 0.000000e+00 : bf16
    %1 = vector.broadcast %cst : bf16 to vector<1x1x4xbf16>
    %2 = vector.extract_strided_slice %0 {offsets = [0, 0, 0], sizes = [1, 15, 4], strides = [1, 1, 1]} : vector<1x16x4xbf16> to vector<1x15x4xbf16>
    %3 = tpu.concatenate %1, %2 in 1 : vector<1x1x4xbf16>, vector<1x15x4xbf16> -> vector<1x16x4xbf16>
    %4 = vector.extract_strided_slice %0 {offsets = [0, 1, 0], sizes = [1, 15, 4], strides = [1, 1, 1]} : vector<1x16x4xbf16> to vector<1x15x4xbf16>
    %5 = tpu.concatenate %4, %1 in 1 : vector<1x15x4xbf16>, vector<1x1x4xbf16> -> vector<1x16x4xbf16>
    %6 = vector.shape_cast %3 : vector<1x16x4xbf16> to vector<16x4xbf16>
    %c0_2 = arith.constant 0 : index
    %c0_3 = arith.constant 0 : index
    %c0_4 = arith.constant 0 : index
    %7 = vector.load %arg2[%c0_2, %c0_3, %c0_4] : memref<3x4x8xbf16, #tpu.memory_space<vmem>>, vector<1x4x8xbf16>
    %8 = vector.shape_cast %7 : vector<1x4x8xbf16> to vector<4x8xbf16>
    %cst_5 = arith.constant dense<0.000000e+00> : vector<16x8xf32>
    %9 = tpu.matmul %6, %8, %cst_5 {dimension_numbers = #tpu.dot_dimension_numbers<[1], [0], [0], [1], [0, 0, 1, 1], [], []>} : vector<16x4xbf16>, vector<4x8xbf16>, vector<16x8xf32> -> vector<16x8xf32>
    %10 = vector.shape_cast %0 : vector<1x16x4xbf16> to vector<16x4xbf16>
    %c1 = arith.constant 1 : index
    %c0_6 = arith.constant 0 : index
    %c0_7 = arith.constant 0 : index
    %11 = vector.load %arg2[%c1, %c0_6, %c0_7] : memref<3x4x8xbf16, #tpu.memory_space<vmem>>, vector<1x4x8xbf16>
    %12 = vector.shape_cast %11 : vector<1x4x8xbf16> to vector<4x8xbf16>
    %cst_8 = arith.constant dense<0.000000e+00> : vector<16x8xf32>
    %13 = tpu.matmul %10, %12, %cst_8 {dimension_numbers = #tpu.dot_dimension_numbers<[1], [0], [0], [1], [0, 0, 1, 1], [], []>} : vector<16x4xbf16>, vector<4x8xbf16>, vector<16x8xf32> -> vector<16x8xf32>
    %14 = arith.addf %9, %13 : vector<16x8xf32>
    %15 = vector.shape_cast %5 : vector<1x16x4xbf16> to vector<16x4xbf16>
    %c2 = arith.constant 2 : index
    %c0_9 = arith.constant 0 : index
    %c0_10 = arith.constant 0 : index
    %16 = vector.load %arg2[%c2, %c0_9, %c0_10] : memref<3x4x8xbf16, #tpu.memory_space<vmem>>, vector<1x4x8xbf16>
    %17 = vector.shape_cast %16 : vector<1x4x8xbf16> to vector<4x8xbf16>
    %cst_11 = arith.constant dense<0.000000e+00> : vector<16x8xf32>
    %18 = tpu.matmul %15, %17, %cst_11 {dimension_numbers = #tpu.dot_dimension_numbers<[1], [0], [0], [1], [0, 0, 1, 1], [], []>} : vector<16x4xbf16>, vector<4x8xbf16>, vector<16x8xf32> -> vector<16x8xf32>
    %19 = arith.addf %14, %18 : vector<16x8xf32>
    %20 = vector.shape_cast %19 : vector<16x8xf32> to vector<1x16x8xf32>
    %21 = arith.truncf %20 : vector<1x16x8xf32> to vector<1x16x8xbf16>
    %c0_12 = arith.constant 0 : index
    %c0_13 = arith.constant 0 : index
    %c0_14 = arith.constant 0 : index
    %22 = vector.load %arg4[%c0_12, %c0_13, %c0_14] : memref<1x16x8xbf16, #tpu.memory_space<vmem>>, vector<1x16x8xbf16>
    tpu.vector_store %arg4[%c0_12, %c0_13, %c0_14], %21 {strides = array<i32>} : memref<1x16x8xbf16, #tpu.memory_space<vmem>>, vector<1x16x8xbf16>,
    %23 = vector.shape_cast %20 : vector<1x16x8xf32> to vector<16x8xf32>
    %cst_15 = arith.constant dense<0.000000e+00> : vector<8xf32>
    %24 = vector.multi_reduction <add>, %23, %cst_15 [0] : vector<16x8xf32> to vector<8xf32>
    %25 = vector.shape_cast %24 : vector<8xf32> to vector<1x8xf32>
    %26 = arith.mulf %23, %23 : vector<16x8xf32>
    %cst_16 = arith.constant dense<0.000000e+00> : vector<8xf32>
    %27 = vector.multi_reduction <add>, %26, %cst_16 [0] : vector<16x8xf32> to vector<8xf32>
    %28 = vector.shape_cast %27 : vector<8xf32> to vector<1x8xf32>
    %29 = tpu.concatenate %25, %28 in 0 : vector<1x8xf32>, vector<1x8xf32> -> vector<2x8xf32>
    %30 = vector.shape_cast %29 : vector<2x8xf32> to vector<1x2x8xf32>
    %c0_17 = arith.constant 0 : index
    %c0_18 = arith.constant 0 : index
    %c0_19 = arith.constant 0 : index
    %31 = vector.load %arg5[%c0_17, %c0_18, %c0_19] : memref<1x2x8xf32, #tpu.memory_space<vmem>>, vector<1x2x8xf32>
    tpu.vector_store %arg5[%c0_17, %c0_18, %c0_19], %30 {strides = array<i32>} : memref<1x2x8xf32, #tpu.memory_space<vmem>>, vector<1x2x8xf32>,
    %32 = vector.shape_cast %0 : vector<1x16x4xbf16> to vector<16x4xbf16>
    %c0_20 = arith.constant 0 : index
    %c0_21 = arith.constant 0 : index
    %33 = vector.load %arg3[%c0_20, %c0_21] : memref<4x8xbf16, #tpu.memory_space<vmem>>, vector<4x8xbf16>
    %cst_22 = arith.constant dense<0.000000e+00> : vector<16x8xf32>
    %34 = tpu.matmul %32, %33, %cst_22 {dimension_numbers = #tpu.dot_dimension_numbers<[1], [0], [0], [1], [0, 0, 1, 1], [], []>} : vector<16x4xbf16>, vector<4x8xbf16>, vector<16x8xf32> -> vector<16x8xf32>
    %35 = vector.shape_cast %34 : vector<16x8xf32> to vector<1x16x8xf32>
    %36 = arith.truncf %35 : vector<1x16x8xf32> to vector<1x16x8xbf16>
    %c0_23 = arith.constant 0 : index
    %c0_24 = arith.constant 0 : index
    %c0_25 = arith.constant 0 : index
    %37 = vector.load %arg6[%c0_23, %c0_24, %c0_25] : memref<1x16x8xbf16, #tpu.memory_space<vmem>>, vector<1x16x8xbf16>
    tpu.vector_store %arg6[%c0_23, %c0_24, %c0_25], %36 {strides = array<i32>} : memref<1x16x8xbf16, #tpu.memory_space<vmem>>, vector<1x16x8xbf16>,
    %38 = vector.shape_cast %35 : vector<1x16x8xf32> to vector<16x8xf32>
    %cst_26 = arith.constant dense<0.000000e+00> : vector<8xf32>
    %39 = vector.multi_reduction <add>, %38, %cst_26 [0] : vector<16x8xf32> to vector<8xf32>
    %40 = vector.shape_cast %39 : vector<8xf32> to vector<1x8xf32>
    %41 = arith.mulf %38, %38 : vector<16x8xf32>
    %cst_27 = arith.constant dense<0.000000e+00> : vector<8xf32>
    %42 = vector.multi_reduction <add>, %41, %cst_27 [0] : vector<16x8xf32> to vector<8xf32>
    %43 = vector.shape_cast %42 : vector<8xf32> to vector<1x8xf32>
    %44 = tpu.concatenate %40, %43 in 0 : vector<1x8xf32>, vector<1x8xf32> -> vector<2x8xf32>
    %45 = vector.shape_cast %44 : vector<2x8xf32> to vector<1x2x8xf32>
    %c0_28 = arith.constant 0 : index
    %c0_29 = arith.constant 0 : index
    %c0_30 = arith.constant 0 : index
    %46 = vector.load %arg7[%c0_28, %c0_29, %c0_30] : memref<1x2x8xf32, #tpu.memory_space<vmem>>, vector<1x2x8xf32>
    tpu.vector_store %arg7[%c0_28, %c0_29, %c0_30], %45 {strides = array<i32>} : memref<1x2x8xf32, #tpu.memory_space<vmem>>, vector<1x2x8xf32>,
    return
  }
  func.func @transform_0(%arg0: i32) -> (i32, i32, i32) {
    %c0_i32 = arith.constant 0 : i32
    %c0_i32_0 = arith.constant 0 : i32
    %c0_i32_1 = arith.constant 0 : i32
    return %arg0, %c0_i32, %c0_i32_0 : i32, i32, i32
  }
  func.func @transform_1(%arg0: i32) -> (i32, i32, i32) {
    %c0_i32 = arith.constant 0 : i32
    %c0_i32_0 = arith.constant 0 : i32
    %c0_i32_1 = arith.constant 0 : i32
    %c0_i32_2 = arith.constant 0 : i32
    return %c0_i32, %c0_i32_0, %c0_i32_1 : i32, i32, i32
  }
  func.func @transform_2(%arg0: i32) -> (i32, i32) {
    %c0_i32 = arith.constant 0 : i32
    %c0_i32_0 = arith.constant 0 : i32
    %c0_i32_1 = arith.constant 0 : i32
    return %c0_i32, %c0_i32_0 : i32, i32
  }
  func.func @transform_3(%arg0: i32) -> (i32, i32, i32) {
    %c0_i32 = arith.constant 0 : i32
    %c0_i32_0 = arith.constant 0 : i32
    %c0_i32_1 = arith.constant 0 : i32
    return %arg0, %c0_i32, %c0_i32_0 : i32, i32, i32
  }
  func.func @transform_4(%arg0: i32) -> (i32, i32, i32) {
    %c0_i32 = arith.constant 0 : i32
    %c0_i32_0 = arith.constant 0 : i32
    %c0_i32_1 = arith.constant 0 : i32
    return %arg0, %c0_i32, %c0_i32_0 : i32, i32, i32
  }
  func.func @transform_5(%arg0: i32) -> (i32, i32, i32) {
    %c0_i32 = arith.constant 0 : i32
    %c0_i32_0 = arith.constant 0 : i32
    %c0_i32_1 = arith.constant 0 : i32
    return %arg0, %c0_i32, %c0_i32_0 : i32, i32, i32
  }
  func.func @transform_6(%arg0: i32) -> (i32, i32, i32) {
    %c0_i32 = arith.constant 0 : i32
    %c0_i32_0 = arith.constant 0 : i32
    %c0_i32_1 = arith.constant 0 : i32
    return %arg0, %c0_i32, %c0_i32_0 : i32, i32, i32
  }
}

</mosaic_0001>

<bundles_post_ra>
// kernel: _lambda_.5
= control target key start
LH: loop header
LB: loop body
LE: loop exit
PB: predicated region body
PF: predicated region fallthrough
CT: control target
= control target key end

     0   :  { %s481_s21 = smov 0   ;;  %s513_s0 = inlined_call_operand.vmem [shape: bf16[2,16,8], index: 0, kind: input, shape index: {}]   ;;  %s514_s1 = inlined_call_operand.vmem [shape: f32[1,1,8], index: 1, kind: input, shape index: {}]   ;;  %s515_s2 = inlined_call_operand.vmem [shape: f32[1,1,8], index: 2, kind: input, shape index: {}]   ;;  %s516_s3 = inlined_call_operand.vmem [shape: bf16[2,16,8], index: 3, kind: input, shape index: {}]   ;;  %s517_s4 = inlined_call_operand.vmem [shape: f32[1,1,8], index: 4, kind: input, shape index: {}]   ;;  %s518_s5 = inlined_call_operand.vmem [shape: f32[1,1,8], index: 5, kind: input, shape index: {}]   ;;  %s519_s6 = inlined_call_operand.vmem [shape: bf16[2,16,8], index: 6, kind: output, shape index: {}]  }
   0x1 LB: > { %s398_s22 = sadd.s32 4294967295, %s444_s21   ;;  %p402_p0 = scmp.ge.s32.totalorder %s444_s21, 1  ;;  %s444_s21 = sphi %s481_s21, %s16_s21  }
   0x2   : > { %p222_p1 = scmp.lt.s32.totalorder %s444_s21, 3 }
   0x4   : > { %p223_p2 = pnand %p402_p0, %p222_p1 }
   0x5   : > { %p257_p3 = scmp.lt.s32.totalorder (!%p223_p2), %s398_s22, 1  ;;  %v409_v0 = vld [vmem:[%s514_s1] ss:$0 sm:$0xff] (!%p223_p2)  ;;  %vm328_vm0 = vcmask (!%p223_p2), 60416  }
   0x6   : > { %226 = sbr.rel (%p223_p2) target bundleno = 31 (0x1f), region = 44  ;;  %v411_v3 = vld [vmem:[%s517_s4] ss:$0 sm:$0xff] (!%p223_p2) }
   0x7   : > { %v410_v8 = vld [vmem:[%s515_s2] ss:$0 sm:$0xff] (!%p223_p2) }
   0x8   : > { %v412_v9 = vld [vmem:[%s518_s5] ss:$0 sm:$0xff] (!%p223_p2) }
   0xd   : > { %s521_s22 = smov (!%p257_p3, %s398_s22), 1 }
   0xe   : > { %s417_s23 = sshll.u32 %s521_s22, 3 }
   0xf   : > { %s261_s26 = scalar_lea.vmem %s513_s0, %s417_s23  ;;  %s266_s29 = scalar_lea.vmem %s516_s3, %s417_s23 }
  0x10   : > { %v423_v1 = vld [vmem:[%s261_s26] sm:$0xff]   ;;  %s271_s16 = scalar_lea.vmem %s519_s6, %s417_s23 }
  0x11   : > { %v427_v2 = vld [vmem:[%s266_s29] sm:$0xff]   ;;  %v424_v4 = vunpack.c.l.bf16 %v423_v1  ;;  %v425_v5 = vunpack.c.h.bf16 %v423_v1 }
  0x12   : > { %v428_v6 = vunpack.c.l.bf16 %v427_v2  ;;  %v429_v7 = vunpack.c.h.bf16 %v427_v2 }
  0x13   : > { %v283_v10 = vmul.f32 %v424_v4, %v409_v0  ;;  %v284_v12 = vmul.f32 %v425_v5, %v409_v0 }
  0x14   : > { %v305_v11 = vmul.f32 %v428_v6, %v411_v3  ;;  %v306_v13 = vmul.f32 %v429_v7, %v411_v3 }
  0x15   : > { %v292_v14 = vadd.f32 %v410_v8, %v283_v10  ;;  %v293_v16 = vadd.f32 %v410_v8, %v284_v12 }
  0x16   : > { %v314_v15 = vadd.f32 %v412_v9, %v305_v11  ;;  %v315_v17 = vadd.f32 %v412_v9, %v306_v13 }
  0x18   : > { %v316_v18 = vadd.f32 %v314_v15, %v292_v14  ;;  %v317_v19 = vadd.f32 %v315_v17, %v293_v16 }
  0x1a   : > { %v318_v20 = vmax.f32 %v316_v18, 0.0  ;;  %v319_v21 = vmax.f32 %v317_v19, 0.0 }
  0x1c   : > { %v420_v22 = vpack.c.bf16 %v318_v20, %v318_v20  ;;  %v421_v23 = vpack.c.bf16 %v319_v21, %v319_v21 }
  0x1e   : > { %329 = vst.msk [vmem:[%s271_s16] sm:$0xf] %vm328_vm0, %v420_v22  ;;  %330 = vst.msk [vmem:[%s271_s16 + $0x4] sm:$0xf] %vm328_vm0, %v421_v23 }
  0x1f PF: > { %s16_s21 = sadd.s32 1, %s444_s21  }
  0x20   : > { %p13_p4 = scmp.ge.s32.totalorder %s16_s21, 4  }
  0x22   :  { %15 = sbr.rel (!%p13_p4) target bundleno = 1 (0x1), region = 77 }

// kernel: _lambda_.4
= control target key start
LH: loop header
LB: loop body
LE: loop exit
PB: predicated region body
PF: predicated region fallthrough
CT: control target
= control target key end

     0   :  { %s731_s21 = smov 0   ;;  %s793_s0 = inlined_call_operand.vmem [shape: bf16[2,16,8], index: 0, kind: input, shape index: {}]   ;;  %s794_s1 = inlined_call_operand.vmem [shape: f32[1,1,8], index: 1, kind: input, shape index: {}]   ;;  %s795_s2 = inlined_call_operand.vmem [shape: f32[1,1,8], index: 2, kind: input, shape index: {}]   ;;  %s796_s3 = inlined_call_operand.vmem [shape: f32[2,1,1], index: 3, kind: input, shape index: {}]   ;;  %s797_s4 = inlined_call_operand.vmem [shape: bf16[3,8,8], index: 4, kind: input, shape index: {}]   ;;  %s798_s5 = inlined_call_operand.vmem [shape: bf16[2,16,8], index: 5, kind: output, shape index: {0}]   ;;  %s799_s6 = inlined_call_operand.vmem [shape: f32[2,2,8], index: 6, kind: output, shape index: {1}]  }
   0x1 LB: > { %s613_s22 = sadd.s32 4294967295, %s691_s21   ;;  %p617_p0 = scmp.ge.s32.totalorder %s691_s21, 1  ;;  %s691_s21 = sphi %s731_s21, %s17_s21  }
   0x2   : > { %p223_p1 = scmp.lt.s32.totalorder %s691_s21, 3 }
   0x4   : > { %p224_p2 = pnand %p617_p0, %p223_p1 }
   0x5   : > { %p260_p3 = scmp.lt.s32.totalorder (!%p224_p2), %s613_s22, 1  ;;  %v693_v0 = vmov (!%p224_p2), 0   ;;  %v626_v2 = vld [vmem:[%s797_s4 + $0x4] sm:$0xf] (!%p224_p2)  ;;  %v694_v3 = vmov (!%p224_p2), 0.0   ;;  %vm340_vm0 = vcmask (!%p224_p2), 1043456  }
   0x6   : > { %227 = sbr.rel (%p224_p2) target bundleno = 402 (0x192), region = 40  ;;  %684 = vset.pattern.permute.xlu0 (!%p224_p2), %v693_v0  ;;  %649 = vmatprep.subr.bf16.mxu1 (!%p224_p2), %v694_v3  ;;  %v342_v4 = vsel (!%p224_p2), %vm340_vm0, %v626_v2, 0  ;;  %vm695_vm1 = vmmov (!%p224_p2), 0   ;;  %v334_v5 = vld [vmem:[%s797_s4] sm:$0xf] (!%p224_p2)  ;;  %vm337_vm2 = vcmask (!%p224_p2), 64512  }
   0x7   : > { %655 = vmatprep.subr.bf16.mxu0 (!%p224_p2), %v694_v3  ;;  %650 = vmatpush3.bf16.msra.mxu1 (!%p224_p2), %v342_v4  ;;  %v389_v6 = vsel (!%p224_p2), %vm340_vm0, %v334_v5, 0  ;;  %v623_v10 = vld [vmem:[%s794_s1] ss:$0 sm:$0xff] (!%p224_p2)  ;;  %vm323_vm3 = vcmask (!%p224_p2), 1040384   ;;  %vm324_vm4 = vsmask.f32 (!%p224_p2), 256 }
   0x8   : > { %651 = vmatprep.mubr.msk.bf16.mxu1 (!%p224_p2), %vm695_vm1, %v694_v3  ;;  %657 = vmatprep.mubr.msk.bf16.mxu0 (!%p224_p2), %vm695_vm1, %v694_v3  ;;  %v624_v13 = vld [vmem:[%s795_s2] ss:$0 sm:$0xff] (!%p224_p2)  ;;  %v629_v25 = vld [vmem:[%s797_s4 + $0x8] sm:$0xf] (!%p224_p2)  ;;  %vm325_vm5 = vmand (!%p224_p2), %vm323_vm3, %vm324_vm4  ;;  %vm330_vm6 = vcmask (!%p224_p2), 1047552   ;;  %vm491_vm9 = vcmask (!%p224_p2), 60416  }
   0x9   : > { %656 = vmatpush3.bf16.msra.mxu0 (!%p224_p2), %v389_v6  ;;  %v438_v27 = vsel (!%p224_p2), %vm340_vm0, %v629_v25, 0  ;;  %vm331_vm7 = vsmask.f32 (!%p224_p2), 7424  ;;  %vm516_vm10 = vcmask (!%p224_p2), 58368  }
   0xa   : > { %661 = vmatprep.subr.bf16.mxu0 (!%p224_p2), %v694_v3  ;;  %vm332_vm8 = vmand (!%p224_p2), %vm330_vm6, %vm331_vm7 }
   0xd   : > { %s801_s22 = smov (!%p260_p3, %s613_s22), 1 }
   0xe   : > { %s267_s25 = scalar_lea.vmem %s796_s3, %s801_s22  ;;  %s635_s30 = sshll.u32 %s801_s22, 3 }
   0xf   : > { %v625_v1 = vld [vmem:[%s267_s25] ss:$0 sm:$0xff]  ;;  %s264_s9 = scalar_lea.vmem %s793_s0, %s635_s30  ;;  %s272_s18 = scalar_lea.vmem %s798_s5, %s635_s30 }
  0x10   : > { %309 = vperm.xlu0 %684, %v625_v1   ;;  %v640_v7 = vld [vmem:[%s264_s9] sm:$0xff]   ;;  %s622_s19 = sshll.u32 %s801_s22, 1 }
  0x11   : > { %v641_v8 = vunpack.c.l.bf16 %v640_v7  ;;  %v642_v9 = vunpack.c.h.bf16 %v640_v7  ;;  %s276_s24 = scalar_lea.vmem %s799_s6, %s622_s19 }
  0x13   : > { %v289_v11 = vmul.f32 %v641_v8, %v623_v10  ;;  %v290_v12 = vmul.f32 %v642_v9, %v623_v10 }
  0x15   : > { %v298_v14 = vadd.f32 %v624_v13, %v289_v11  ;;  %v299_v15 = vadd.f32 %v624_v13, %v290_v12 }
  0x17   : > { %v300_v16 = vmax.f32 %v298_v14, 0.0  ;;  %v301_v17 = vmax.f32 %v299_v15, 0.0 }
  0x8f   : > { %v310_v18 = vpop.permute.xlu0 %309 }
  0x90   : > { %v312_v19 = vmul.f32 %v310_v18, %v300_v16  ;;  %v313_v20 = vmul.f32 %v310_v18, %v301_v17 }
  0x92   : > { %v314_v21 = vpack.c.bf16 %v313_v20, %v312_v19 }
  0x94   : > { %v316_v22 = vshrl.u32 %v314_v21, 16  ;;  %652 = vmatmul.mubr.msk.bf16.vlgmr.msra.gmra.mrb[0].mxu1 %vm337_vm2, %v314_v21  ;;  %v319_v23 = vshll.u32 %v314_v21, 16 }
  0x96   : > { %v318_v24 = vrot.slane %v316_v22, 7  ;;  %v327_v29 = vrot.slane %v319_v23, 1 }
  0x98   : > { %v321_v26 = vor.u32 %v319_v23, %v318_v24  ;;  %v328_v30 = vor.u32 %v327_v29, %v316_v22 }
  0x9a   : > { %v326_v28 = vsel %vm325_vm5, 0, %v321_v26  ;;  %v333_v31 = vsel %vm332_vm8, %v328_v30, 0 }
  0x9b   : > { %658 = vmatmul.mubr.msk.bf16.vlgmr.msra.gmra.mrb[0].mxu0 %vm337_vm2, %v326_v28 }
  0x9c   : > { %662 = vmatpush3.bf16.msra.mxu0 %v438_v27  ;;  %663 = vmatprep.mubr.msk.bf16.mxu0 %vm695_vm1, %v694_v3 }
  0xa7   : > { %664 = vmatmul.mubr.msk.bf16.vlgmr.msra.gmra.mrb[0].mxu0 %vm337_vm2, %v333_v31 }
 0x167   : > { %v378_v32 = vpop.f32.mrb[0].mxu1 }
 0x168   : > { %v653_v33 = vpop.f32.mrb[1].mxu1 }
 0x169   : > { %v381_v34 = vpop.f32.mrb[2].mxu1 }
 0x16a   : > { %v654_v35 = vpop.f32.mrb[3].mxu1 }
 0x17a   : > { %v474_v36 = vpop.f32.mrb[0].mxu0 }
 0x17b   : > { %v667_v37 = vadd.f32 %v474_v36, %v378_v32  ;;  %v665_v38 = vpop.f32.mrb[1].mxu0 }
 0x17c   : > { %v477_v39 = vpop.f32.mrb[2].mxu0 }
 0x17d   : > { %v637_v40 = vpack.c.bf16 %v667_v37, %v667_v37  ;;  %v503_v41 = vmul.f32 %v667_v37, %v667_v37  ;;  %v668_v42 = vadd.f32 %v477_v39, %v381_v34  ;;  %v666_v43 = vpop.f32.mrb[3].mxu0  ;;  %v494_v44 = vsel %vm337_vm2, %v667_v37, 0.0 }
 0x17f   : > { %492 = vst.msk [vmem:[%s272_s18] sm:$0xf] %vm491_vm9, %v637_v40  ;;  %v638_v45 = vpack.c.bf16 %v668_v42, %v668_v42  ;;  %v495_v46 = vsel %vm337_vm2, %v668_v42, 0.0  ;;  %v504_v47 = vmul.f32 %v668_v42, %v668_v42  ;;  %v505_v49 = vsel %vm337_vm2, %v503_v41, 0.0 }
 0x180   : > { %v496_v48 = vadd.f32 %v495_v46, %v494_v44 }
 0x181   : > { %493 = vst.msk [vmem:[%s272_s18 + $0x4] sm:$0xf] %vm491_vm9, %v638_v45  ;;  %v506_v50 = vsel %vm337_vm2, %v504_v47, 0.0 }
 0x182   : > { %v497_v51 = vrot.slane %v496_v48, 4  ;;  %v507_v52 = vadd.f32 %v506_v50, %v505_v49 }
 0x184   : > { %v498_v53 = vadd.f32 %v497_v51, %v496_v48  ;;  %v508_v54 = vrot.slane %v507_v52, 4 }
 0x186   : > { %v499_v55 = vrot.slane %v498_v53, 2  ;;  %v509_v56 = vadd.f32 %v508_v54, %v507_v52 }
 0x188   : > { %v500_v57 = vadd.f32 %v499_v55, %v498_v53  ;;  %v510_v58 = vrot.slane %v509_v56, 2 }
 0x18a   : > { %v501_v59 = vrot.slane %v500_v57, 1  ;;  %v511_v60 = vadd.f32 %v510_v58, %v509_v56 }
 0x18c   : > { %v512_v61 = vrot.slane %v511_v60, 1  ;;  %v502_v62 = vadd.f32 %v501_v59, %v500_v57 }
 0x18e   : > { %v513_v63 = vadd.f32 %v512_v61, %v511_v60 }
 0x190   : > { %v515_v0 = vsel %vm323_vm3, %v502_v62, %v513_v63 }
 0x191   : > { %517 = vst.msk [vmem:[%s276_s24] sm:$0x3] %vm516_vm10, %v515_v0 }
 0x192 PF: > { %s17_s21 = sadd.s32 1, %s691_s21  }
 0x193   : > { %p14_p4 = scmp.ge.s32.totalorder %s17_s21, 4  }
 0x195   :  { %16 = sbr.rel (!%p14_p4) target bundleno = 1 (0x1), region = 87 }

// kernel: _lambda_.3
= control target key start
LH: loop header
LB: loop body
LE: loop exit
PB: predicated region body
PF: predicated region fallthrough
CT: control target
= control target key end

     0   :  { %s851_s21 = smov 0   ;;  %s931_s0 = inlined_call_operand.vmem [shape: bf16[2,16,4], index: 0, kind: input, shape index: {}]   ;;  %s932_s1 = inlined_call_operand.vmem [shape: bf16[3,4,8], index: 1, kind: input, shape index: {}]   ;;  %s933_s2 = inlined_call_operand.vmem [shape: bf16[4,8], index: 2, kind: input, shape index: {}]   ;;  %s934_s3 = inlined_call_operand.vmem [shape: bf16[2,16,8], index: 3, kind: output, shape index: {0}]   ;;  %s935_s4 = inlined_call_operand.vmem [shape: f32[2,2,8], index: 4, kind: output, shape index: {1}]   ;;  %s936_s5 = inlined_call_operand.vmem [shape: bf16[2,16,8], index: 5, kind: output, shape index: {2}]   ;;  %s937_s6 = inlined_call_operand.vmem [shape: f32[2,2,8], index: 6, kind: output, shape index: {3}]  }
   0x1 LB: > { %s724_s22 = sadd.s32 4294967295, %s812_s21   ;;  %p728_p0 = scmp.ge.s32.totalorder %s812_s21, 1  ;;  %s812_s21 = sphi %s851_s21, %s17_s21  }
   0x2   : > { %p219_p1 = scmp.lt.s32.totalorder %s812_s21, 3 }
   0x4   : > { %p220_p2 = pnand %p728_p0, %p219_p1 }
   0x5   : > { %v738_v0 = vld [vmem:[%s932_s1 + $0x2] sm:$0x3] (!%p220_p2)  ;;  %vm318_vm0 = vcmask (!%p220_p2), 1041408   ;;  %p262_p3 = scmp.lt.s32.totalorder (!%p220_p2), %s724_s22, 1  ;;  %v814_v1 = vmov (!%p220_p2), 0.0   ;;  %vm815_vm1 = vmmov (!%p220_p2), 0  }
   0x6   : > { %223 = sbr.rel (%p220_p2) target bundleno = 272 (0x110), region = 32  ;;  %765 = vmatprep.subr.bf16.mxu1 (!%p220_p2), %v814_v1  ;;  %v320_v2 = vsel (!%p220_p2), %vm318_vm0, %v738_v0, 0  ;;  %767 = vmatprep.mubr.msk.bf16.mxu1 (!%p220_p2), %vm815_vm1, %v814_v1  ;;  %v312_v3 = vld [vmem:[%s932_s1] sm:$0x3] (!%p220_p2)  ;;  %vm315_vm2 = vcmask (!%p220_p2), 31744   ;;  %vm301_vm3 = vcmask (!%p220_p2), 1040384  }
   0x7   : > { %766 = vmatpush3.bf16.msra.mxu1 (!%p220_p2), %v320_v2  ;;  %771 = vmatprep.subr.bf16.mxu0 (!%p220_p2), %v814_v1  ;;  %v367_v4 = vsel (!%p220_p2), %vm318_vm0, %v312_v3, 0  ;;  %v497_v5 = vld [vmem:[%s933_s2] sm:$0x3] (!%p220_p2)  ;;  %vm302_vm4 = vsmask.f32 (!%p220_p2), 256  ;;  %vm308_vm6 = vcmask (!%p220_p2), 1047552  }
   0x8   : > { %772 = vmatpush3.bf16.msra.mxu0 (!%p220_p2), %v367_v4  ;;  %773 = vmatprep.mubr.msk.bf16.mxu0 (!%p220_p2), %vm815_vm1, %v814_v1  ;;  %v499_v7 = vsel (!%p220_p2), %vm318_vm0, %v497_v5, 0  ;;  %v741_v11 = vld [vmem:[%s932_s1 + $0x4] sm:$0x3] (!%p220_p2)  ;;  %vm303_vm5 = vmand (!%p220_p2), %vm301_vm3, %vm302_vm4  ;;  %vm309_vm7 = vsmask.f32 (!%p220_p2), 7424  ;;  %vm472_vm9 = vcmask (!%p220_p2), 64512  }
   0x9   : > { %777 = vmatprep.subr.bf16.mxu0 (!%p220_p2), %v814_v1  ;;  %783 = vmatprep.subr.bf16.mxu1 (!%p220_p2), %v814_v1  ;;  %v416_v13 = vsel (!%p220_p2), %vm318_vm0, %v741_v11, 0  ;;  %vm310_vm8 = vmand (!%p220_p2), %vm308_vm6, %vm309_vm7  ;;  %vm469_vm10 = vcmask (!%p220_p2), 60416   ;;  %vm495_vm11 = vcmask (!%p220_p2), 58368  }
   0xd   : > { %s939_s22 = smov (!%p262_p3, %s724_s22), 1 }
   0xe   : > { %s875_s29 = sshll.u32 %s939_s22, 3  ;;  %s733_s17 = sshll.u32 %s939_s22, 1 }
   0xf   : > { %s266_s8 = scalar_lea.vmem %s931_s0, %s875_s29  ;;  %s280_s13 = scalar_lea.vmem %s936_s5, %s875_s29 }
  0x10   : > { %v805_v6 = vld [vmem:[%s266_s8] sm:$0xff]   ;;  %s271_s16 = scalar_lea.vmem %s934_s3, %s875_s29  ;;  %s284_s20 = scalar_lea.vmem %s937_s6, %s733_s17 }
  0x11   : > { %768 = vmatmul.mubr.msk.bf16.vlgmr.msra.gmra.mrb[0].mxu1 %vm315_vm2, %v805_v6  ;;  %v294_v8 = vshrl.u32 %v805_v6, 16  ;;  %v297_v9 = vshll.u32 %v805_v6, 16  ;;  %s275_s25 = scalar_lea.vmem %s935_s4, %s733_s17 }
  0x12   : > { %784 = vmatpush3.bf16.msra.mxu1 %v499_v7  ;;  %785 = vmatprep.mubr.msk.bf16.mxu1 %vm815_vm1, %v814_v1 }
  0x13   : > { %v296_v10 = vrot.slane %v294_v8, 7  ;;  %v305_v15 = vrot.slane %v297_v9, 1 }
  0x15   : > { %v299_v12 = vor.u32 %v297_v9, %v296_v10  ;;  %v306_v16 = vor.u32 %v305_v15, %v294_v8 }
  0x17   : > { %v304_v14 = vsel %vm303_vm5, 0, %v299_v12  ;;  %v311_v17 = vsel %vm310_vm8, %v306_v16, 0 }
  0x18   : > { %774 = vmatmul.mubr.msk.bf16.vlgmr.msra.gmra.mrb[0].mxu0 %vm315_vm2, %v304_v14 }
  0x19   : > { %778 = vmatpush3.bf16.msra.mxu0 %v416_v13  ;;  %786 = vmatmul.mubr.msk.bf16.vlgmr.msra.gmra.mrb[4].mxu1 %vm315_vm2, %v805_v6 }
  0x1a   : > { %779 = vmatprep.mubr.msk.bf16.mxu0 %vm815_vm1, %v814_v1 }
  0x24   : > { %780 = vmatmul.mubr.msk.bf16.vlgmr.msra.gmra.mrb[0].mxu0 %vm315_vm2, %v311_v17 }
  0xe4   : > { %v356_v18 = vpop.f32.mrb[0].mxu1 }
  0xe5   : > { %v769_v19 = vpop.f32.mrb[1].mxu1 }
  0xe6   : > { %v359_v20 = vpop.f32.mrb[2].mxu1 }
  0xe7   : > { %v770_v21 = vpop.f32.mrb[3].mxu1 }
  0xec   : > { %v535_v22 = vpop.f32.mrb[4].mxu1 }
  0xed   : > { %v755_v23 = vpack.c.bf16 %v535_v22, %v535_v22  ;;  %v552_v24 = vsel %vm472_vm9, %v535_v22, 0.0  ;;  %v561_v25 = vmul.f32 %v535_v22, %v535_v22  ;;  %v787_v26 = vpop.f32.mrb[5].mxu1 }
  0xee   : > { %v538_v27 = vpop.f32.mrb[6].mxu1 }
  0xef   : > { %550 = vst.msk [vmem:[%s280_s13] sm:$0xf] %vm469_vm10, %v755_v23  ;;  %v563_v28 = vsel %vm472_vm9, %v561_v25, 0.0  ;;  %v756_v29 = vpack.c.bf16 %v538_v27, %v538_v27  ;;  %v553_v30 = vsel %vm472_vm9, %v538_v27, 0.0  ;;  %v562_v31 = vmul.f32 %v538_v27, %v538_v27  ;;  %v788_v32 = vpop.f32.mrb[7].mxu1 }
  0xf0   : > { %v554_v33 = vadd.f32 %v553_v30, %v552_v24 }
  0xf1   : > { %551 = vst.msk [vmem:[%s280_s13 + $0x4] sm:$0xf] %vm469_vm10, %v756_v29  ;;  %v564_v34 = vsel %vm472_vm9, %v562_v31, 0.0 }
  0xf2   : > { %v555_v35 = vrot.slane %v554_v33, 4  ;;  %v565_v36 = vadd.f32 %v564_v34, %v563_v28 }
  0xf4   : > { %v556_v37 = vadd.f32 %v555_v35, %v554_v33  ;;  %v566_v38 = vrot.slane %v565_v36, 4 }
  0xf6   : > { %v557_v39 = vrot.slane %v556_v37, 2  ;;  %v567_v40 = vadd.f32 %v566_v38, %v565_v36 }
  0xf7   : > { %v452_v41 = vpop.f32.mrb[0].mxu0 }
  0xf8   : > { %v558_v42 = vadd.f32 %v557_v39, %v556_v37  ;;  %v568_v43 = vrot.slane %v567_v40, 2  ;;  %v789_v44 = vadd.f32 %v452_v41, %v356_v18  ;;  %v781_v45 = vpop.f32.mrb[1].mxu0 }
  0xf9   : > { %v455_v46 = vpop.f32.mrb[2].mxu0 }
  0xfa   : > { %v559_v47 = vrot.slane %v558_v42, 1  ;;  %v569_v48 = vadd.f32 %v568_v43, %v567_v40  ;;  %v753_v49 = vpack.c.bf16 %v789_v44, %v789_v44  ;;  %v782_v50 = vpop.f32.mrb[3].mxu0  ;;  %v482_v51 = vmul.f32 %v789_v44, %v789_v44 }
  0xfb   : > { %v790_v52 = vadd.f32 %v455_v46, %v359_v20  ;;  %v473_v55 = vsel %vm472_vm9, %v789_v44, 0.0 }
  0xfc   : > { %v560_v53 = vadd.f32 %v559_v47, %v558_v42  ;;  %v570_v54 = vrot.slane %v569_v48, 1  ;;  %470 = vst.msk [vmem:[%s271_s16] sm:$0xf] %vm469_vm10, %v753_v49  ;;  %v484_v61 = vsel %vm472_vm9, %v482_v51, 0.0 }
  0xfd   : > { %v754_v56 = vpack.c.bf16 %v790_v52, %v790_v52  ;;  %v474_v57 = vsel %vm472_vm9, %v790_v52, 0.0  ;;  %v483_v58 = vmul.f32 %v790_v52, %v790_v52 }
  0xfe   : > { %v571_v59 = vadd.f32 %v570_v54, %v569_v48  ;;  %v475_v60 = vadd.f32 %v474_v57, %v473_v55 }
  0xff   : > { %471 = vst.msk [vmem:[%s271_s16 + $0x4] sm:$0xf] %vm469_vm10, %v754_v56  ;;  %v485_v62 = vsel %vm472_vm9, %v483_v58, 0.0 }
 0x100   : > { %v572_v63 = vsel %vm301_vm3, %v560_v53, %v571_v59  ;;  %v476_v0 = vrot.slane %v475_v60, 4  ;;  %v486_v1 = vadd.f32 %v485_v62, %v484_v61 }
 0x101   : > { %573 = vst.msk [vmem:[%s284_s20] sm:$0x3] %vm495_vm11, %v572_v63 }
 0x102   : > { %v477_v2 = vadd.f32 %v476_v0, %v475_v60  ;;  %v487_v3 = vrot.slane %v486_v1, 4 }
 0x104   : > { %v478_v4 = vrot.slane %v477_v2, 2  ;;  %v488_v5 = vadd.f32 %v487_v3, %v486_v1 }
 0x106   : > { %v479_v6 = vadd.f32 %v478_v4, %v477_v2  ;;  %v489_v7 = vrot.slane %v488_v5, 2 }
 0x108   : > { %v480_v8 = vrot.slane %v479_v6, 1  ;;  %v490_v9 = vadd.f32 %v489_v7, %v488_v5 }
 0x10a   : > { %v491_v10 = vrot.slane %v490_v9, 1  ;;  %v481_v11 = vadd.f32 %v480_v8, %v479_v6 }
 0x10c   : > { %v492_v12 = vadd.f32 %v491_v10, %v490_v9 }
 0x10e   : > { %v494_v13 = vsel %vm301_vm3, %v481_v11, %v492_v12 }
 0x10f   : > { %496 = vst.msk [vmem:[%s275_s25] sm:$0x3] %vm495_vm11, %v494_v13 }
 0x110 PF: > { %s17_s21 = sadd.s32 1, %s812_s21  }
 0x111   : > { %p14_p4 = scmp.ge.s32.totalorder %s17_s21, 4  }
 0x113   :  { %16 = sbr.rel (!%p14_p4) target bundleno = 1 (0x1), region = 100 }

</bundles_post_ra>
